<compile_context>
chip_gen: v5e
topology: v5e:2x2
jax: 0.10.0
libtpu: 0.0.40
codegen_flags: <defaults>
</compile_context>

<pallas_src>
import jax
import jax.numpy as jnp
from jax.experimental import pallas as pl
from jax.experimental.pallas import tpu as pltpu


def _mlp_kernel(x_ref, w1_ref, b1_ref, w2_ref, b2_ref,
                wr_ref, br_ref, wc_ref, bc_ref,
                reg_ref, cls_ref):
    # shared: Linear(input_dim, 64) -> ReLU
    h1 = jnp.dot(x_ref[...], w1_ref[...],
                 preferred_element_type=jnp.float32) + b1_ref[...]
    h1 = jnp.maximum(h1, 0.0)

    # shared: Linear(64, 32) -> ReLU
    h2 = jnp.dot(h1, w2_ref[...],
                 preferred_element_type=jnp.float32) + b2_ref[...]
    h2 = jnp.maximum(h2, 0.0)

    # regression head: Linear(32, 4)   — narrow, lane-masked store
    reg = jnp.dot(h2, wr_ref[...],
                  preferred_element_type=jnp.float32) + br_ref[...]
    reg_ref[...] = reg.astype(reg_ref.dtype)

    # classification head: Linear(32, num_classes) — narrow, lane-masked store
    cls = jnp.dot(h2, wc_ref[...],
                  preferred_element_type=jnp.float32) + bc_ref[...]
    cls_ref[...] = cls.astype(cls_ref.dtype)


def prepare_params(params):
    """One-time parameter prep (hoisted out of the per-call forward).

    Weights stay [in, out] f32; biases become (1, N) rows for clean sublane
    broadcast inside the kernel.
    """
    f32 = jnp.float32
    return dict(
        w1=params["w1"].astype(f32), b1=params["b1"].reshape(1, -1).astype(f32),
        w2=params["w2"].astype(f32), b2=params["b2"].reshape(1, -1).astype(f32),
        wr=params["wr"].astype(f32), br=params["br"].reshape(1, -1).astype(f32),
        wc=params["wc"].astype(f32), bc=params["bc"].reshape(1, -1).astype(f32),
    )


def _choose_tile(batch, input_dim, num_out, tile_m):
    """Pick a batch tile: big enough to amortize step overhead, small enough
    to fit conservative scoped VMEM (v5e 16 MiB), and <= ceil(batch/2) so a
    v7x megacore gets >= 2 grid steps whenever the batch allows it."""
    if batch <= 8:
        # Full-extent block (equal to array dim) — always legal.
        return batch

    # >= 2 grid steps when possible (both v7x TensorCores get work).
    tm = min(tile_m, ((pl.cdiv(batch, 2) + 7) // 8) * 8)

    # Conservative VMEM budget: double-buffered x tiles + double-buffered
    # narrow outputs + f32 intermediates (h1: 64, h2: 32 cols). Weights tiny.
    vmem_budget = 12 * 1024 * 1024
    bytes_per_row = 4 * (2 * input_dim + 64 + 32 + 2 * num_out)
    max_tm_vmem = max(8, (vmem_budget // bytes_per_row) // 8 * 8)
    tm = min(tm, max_tm_vmem)

    # Never larger than the (8-rounded) batch itself.
    tm = min(tm, ((batch + 7) // 8) * 8)
    return max(8, tm)


def absorp_gen_multitask_forward(x, prepared, *, tile_m=2048):
    """Full forward pass in one batch-gridded Pallas kernel.

    x: [batch, input_dim] float32
    prepared: output of prepare_params().
    Returns (reg_output [batch, 4], class_logits [batch, num_classes]).
    """
    batch, input_dim = x.shape
    num_reg = prepared["wr"].shape[1]
    num_classes = prepared["wc"].shape[1]

    tm = _choose_tile(batch, input_dim, num_reg + num_classes, tile_m)
    grid = (pl.cdiv(batch, tm),)   # ragged last block is masked by Pallas

    def const_spec(arr):
        # Full-array block, same block every grid step -> stays VMEM-resident.
        return pl.BlockSpec(arr.shape, lambda i: (0, 0))

    reg, cls = pl.pallas_call(
        _mlp_kernel,
        out_shape=(
            jax.ShapeDtypeStruct((batch, num_reg), jnp.float32),
            jax.ShapeDtypeStruct((batch, num_classes), jnp.float32),
        ),
        grid=grid,
        in_specs=[
            pl.BlockSpec((tm, input_dim), lambda i: (i, 0)),   # x tile
            const_spec(prepared["w1"]), const_spec(prepared["b1"]),
            const_spec(prepared["w2"]), const_spec(prepared["b2"]),
            const_spec(prepared["wr"]), const_spec(prepared["br"]),
            const_spec(prepared["wc"]), const_spec(prepared["bc"]),
        ],
        out_specs=[
            pl.BlockSpec((tm, num_reg), lambda i: (i, 0)),
            pl.BlockSpec((tm, num_classes), lambda i: (i, 0)),
        ],
        compiler_params=pltpu.CompilerParams(
            dimension_semantics=("parallel",)),
    )(x,
      prepared["w1"], prepared["b1"],
      prepared["w2"], prepared["b2"],
      prepared["wr"], prepared["br"],
      prepared["wc"], prepared["bc"])

    return reg, cls


def init_params(key, input_dim, num_classes=3):
    """Deterministic parameter init (uniform, PyTorch-like fan_in bound)."""
    def linear(k, fan_in, fan_out):
        kw, kb = jax.random.split(k)
        bound = 1.0 / jnp.sqrt(jnp.float32(fan_in))
        # Stored as [in, out] (transposed relative to PyTorch's [out, in]).
        w = jax.random.uniform(kw, (fan_in, fan_out), jnp.float32, -bound, bound)
        b = jax.random.uniform(kb, (fan_out,), jnp.float32, -bound, bound)
        return w, b

    k1, k2, k3, k4 = jax.random.split(key, 4)
    w1, b1 = linear(k1, input_dim, 64)
    w2, b2 = linear(k2, 64, 32)
    wr, br = linear(k3, 32, 4)
    wc, bc = linear(k4, 32, num_classes)
    return dict(w1=w1, b1=b1, w2=w2, b2=b2, wr=wr, br=br, wc=wc, bc=bc)


def _reference_forward(x, p):
    h1 = jnp.maximum(x @ p["w1"] + p["b1"], 0.0)
    h2 = jnp.maximum(h1 @ p["w2"] + p["b2"], 0.0)
    return h2 @ p["wr"] + p["br"], h2 @ p["wc"] + p["bc"]


if __name__ == "__main__":
    key = jax.random.PRNGKey(0)
    kx, kp = jax.random.split(key)

    batch, input_dim, num_classes = 8, 32, 3
    x = jax.random.normal(kx, (batch, input_dim), jnp.float32)
    params = init_params(kp, input_dim, num_classes)
    prepared = prepare_params(params)   # one-time prep, outside the forward

    reg_out, cls_out = absorp_gen_multitask_forward(x, prepared)
    jax.block_until_ready((reg_out, cls_out))

    # Sanity check against a pure-JAX f32 reference (all-f32 matmuls in the
    # kernel -> tight tolerance).
    reg_ref, cls_ref = _reference_forward(x, params)
    assert reg_out.shape == (batch, 4) and cls_out.shape == (batch, num_classes)
    assert jnp.allclose(reg_out, reg_ref, atol=1e-4, rtol=1e-4)
    assert jnp.allclose(cls_out, cls_ref, atol=1e-4, rtol=1e-4)

    print("KERNEL_OK")
</pallas_src>

<mosaic_0001>
module attributes {stable_mosaic.version = 11 : i64} {
  func.func @_mlp_kernel(%arg0: i32, %arg1: memref<8x32xf32, #tpu.memory_space<vmem>>, %arg2: memref<32x64xf32, #tpu.memory_space<vmem>>, %arg3: memref<1x64xf32, #tpu.memory_space<vmem>>, %arg4: memref<64x32xf32, #tpu.memory_space<vmem>>, %arg5: memref<1x32xf32, #tpu.memory_space<vmem>>, %arg6: memref<32x4xf32, #tpu.memory_space<vmem>>, %arg7: memref<1x4xf32, #tpu.memory_space<vmem>>, %arg8: memref<32x3xf32, #tpu.memory_space<vmem>>, %arg9: memref<1x3xf32, #tpu.memory_space<vmem>>, %arg10: memref<8x4xf32, #tpu.memory_space<vmem>>, %arg11: memref<8x3xf32, #tpu.memory_space<vmem>>) attributes {dimension_semantics = [#tpu.dimension_semantics<parallel>], iteration_bounds = array<i64: 1>, scalar_prefetch = 0 : i64, scratch_operands = 0 : i64, tpu.core_type = #tpu.core_type<tc>, window_params = [{transform_indices = @transform_0, window_bounds = array<i64: 8, 32>}, {pipeline_mode = #tpu.pipeline_mode<synchronous>, transform_indices = @transform_1, window_bounds = array<i64: 32, 64>}, {pipeline_mode = #tpu.pipeline_mode<synchronous>, transform_indices = @transform_2, window_bounds = array<i64: 1, 64>}, {pipeline_mode = #tpu.pipeline_mode<synchronous>, transform_indices = @transform_3, window_bounds = array<i64: 64, 32>}, {pipeline_mode = #tpu.pipeline_mode<synchronous>, transform_indices = @transform_4, window_bounds = array<i64: 1, 32>}, {pipeline_mode = #tpu.pipeline_mode<synchronous>, transform_indices = @transform_5, window_bounds = array<i64: 32, 4>}, {pipeline_mode = #tpu.pipeline_mode<synchronous>, transform_indices = @transform_6, window_bounds = array<i64: 1, 4>}, {pipeline_mode = #tpu.pipeline_mode<synchronous>, transform_indices = @transform_7, window_bounds = array<i64: 32, 3>}, {pipeline_mode = #tpu.pipeline_mode<synchronous>, transform_indices = @transform_8, window_bounds = array<i64: 1, 3>}, {transform_indices = @transform_9, window_bounds = array<i64: 8, 4>}, {transform_indices = @transform_10, window_bounds = array<i64: 8, 3>}]} {
    %c0 = arith.constant 0 : index
    %c0_0 = arith.constant 0 : index
    %0 = vector.load %arg1[%c0, %c0_0] : memref<8x32xf32, #tpu.memory_space<vmem>>, vector<8x32xf32>
    %c0_1 = arith.constant 0 : index
    %c0_2 = arith.constant 0 : index
    %1 = vector.load %arg2[%c0_1, %c0_2] : memref<32x64xf32, #tpu.memory_space<vmem>>, vector<32x64xf32>
    %cst = arith.constant dense<0.000000e+00> : vector<8x64xf32>
    %2 = tpu.matmul %0, %1, %cst {dimension_numbers = #tpu.dot_dimension_numbers<[1], [0], [0], [1], [0, 0, 1, 1], [], []>} : vector<8x32xf32>, vector<32x64xf32>, vector<8x64xf32> -> vector<8x64xf32>
    %c0_3 = arith.constant 0 : index
    %c0_4 = arith.constant 0 : index
    %3 = vector.load %arg3[%c0_3, %c0_4] : memref<1x64xf32, #tpu.memory_space<vmem>>, vector<1x64xf32>
    %4 = vector.broadcast %3 : vector<1x64xf32> to vector<8x64xf32>
    %5 = arith.addf %2, %4 : vector<8x64xf32>
    %cst_5 = arith.constant 0.000000e+00 : f32
    %6 = vector.broadcast %cst_5 : f32 to vector<8x64xf32>
    %7 = arith.maximumf %5, %6 : vector<8x64xf32>
    %c0_6 = arith.constant 0 : index
    %c0_7 = arith.constant 0 : index
    %8 = vector.load %arg4[%c0_6, %c0_7] : memref<64x32xf32, #tpu.memory_space<vmem>>, vector<64x32xf32>
    %cst_8 = arith.constant dense<0.000000e+00> : vector<8x32xf32>
    %9 = tpu.matmul %7, %8, %cst_8 {dimension_numbers = #tpu.dot_dimension_numbers<[1], [0], [0], [1], [0, 0, 1, 1], [], []>} : vector<8x64xf32>, vector<64x32xf32>, vector<8x32xf32> -> vector<8x32xf32>
    %c0_9 = arith.constant 0 : index
    %c0_10 = arith.constant 0 : index
    %10 = vector.load %arg5[%c0_9, %c0_10] : memref<1x32xf32, #tpu.memory_space<vmem>>, vector<1x32xf32>
    %11 = vector.broadcast %10 : vector<1x32xf32> to vector<8x32xf32>
    %12 = arith.addf %9, %11 : vector<8x32xf32>
    %cst_11 = arith.constant 0.000000e+00 : f32
    %13 = vector.broadcast %cst_11 : f32 to vector<8x32xf32>
    %14 = arith.maximumf %12, %13 : vector<8x32xf32>
    %c0_12 = arith.constant 0 : index
    %c0_13 = arith.constant 0 : index
    %15 = vector.load %arg6[%c0_12, %c0_13] : memref<32x4xf32, #tpu.memory_space<vmem>>, vector<32x4xf32>
    %cst_14 = arith.constant dense<0.000000e+00> : vector<8x4xf32>
    %16 = tpu.matmul %14, %15, %cst_14 {dimension_numbers = #tpu.dot_dimension_numbers<[1], [0], [0], [1], [0, 0, 1, 1], [], []>} : vector<8x32xf32>, vector<32x4xf32>, vector<8x4xf32> -> vector<8x4xf32>
    %c0_15 = arith.constant 0 : index
    %c0_16 = arith.constant 0 : index
    %17 = vector.load %arg7[%c0_15, %c0_16] : memref<1x4xf32, #tpu.memory_space<vmem>>, vector<1x4xf32>
    %18 = vector.broadcast %17 : vector<1x4xf32> to vector<8x4xf32>
    %19 = arith.addf %16, %18 : vector<8x4xf32>
    %c0_17 = arith.constant 0 : index
    %c0_18 = arith.constant 0 : index
    %20 = vector.load %arg10[%c0_17, %c0_18] : memref<8x4xf32, #tpu.memory_space<vmem>>, vector<8x4xf32>
    tpu.vector_store %arg10[%c0_17, %c0_18], %19 {strides = array<i32>} : memref<8x4xf32, #tpu.memory_space<vmem>>, vector<8x4xf32>,
    %c0_19 = arith.constant 0 : index
    %c0_20 = arith.constant 0 : index
    %21 = vector.load %arg8[%c0_19, %c0_20] : memref<32x3xf32, #tpu.memory_space<vmem>>, vector<32x3xf32>
    %cst_21 = arith.constant dense<0.000000e+00> : vector<8x3xf32>
    %22 = tpu.matmul %14, %21, %cst_21 {dimension_numbers = #tpu.dot_dimension_numbers<[1], [0], [0], [1], [0, 0, 1, 1], [], []>} : vector<8x32xf32>, vector<32x3xf32>, vector<8x3xf32> -> vector<8x3xf32>
    %c0_22 = arith.constant 0 : index
    %c0_23 = arith.constant 0 : index
    %23 = vector.load %arg9[%c0_22, %c0_23] : memref<1x3xf32, #tpu.memory_space<vmem>>, vector<1x3xf32>
    %24 = vector.broadcast %23 : vector<1x3xf32> to vector<8x3xf32>
    %25 = arith.addf %22, %24 : vector<8x3xf32>
    %c0_24 = arith.constant 0 : index
    %c0_25 = arith.constant 0 : index
    %26 = vector.load %arg11[%c0_24, %c0_25] : memref<8x3xf32, #tpu.memory_space<vmem>>, vector<8x3xf32>
    tpu.vector_store %arg11[%c0_24, %c0_25], %25 {strides = array<i32>} : memref<8x3xf32, #tpu.memory_space<vmem>>, vector<8x3xf32>,
    return
  }
  func.func @transform_0(%arg0: i32) -> (i32, i32) {
    %c0_i32 = arith.constant 0 : i32
    %c0_i32_0 = arith.constant 0 : i32
    return %arg0, %c0_i32 : i32, i32
  }
  func.func @transform_1(%arg0: i32) -> (i32, i32) {
    %c0_i32 = arith.constant 0 : i32
    %c0_i32_0 = arith.constant 0 : i32
    %c0_i32_1 = arith.constant 0 : i32
    return %c0_i32, %c0_i32_0 : i32, i32
  }
  func.func @transform_2(%arg0: i32) -> (i32, i32) {
    %c0_i32 = arith.constant 0 : i32
    %c0_i32_0 = arith.constant 0 : i32
    %c0_i32_1 = arith.constant 0 : i32
    return %c0_i32, %c0_i32_0 : i32, i32
  }
  func.func @transform_3(%arg0: i32) -> (i32, i32) {
    %c0_i32 = arith.constant 0 : i32
    %c0_i32_0 = arith.constant 0 : i32
    %c0_i32_1 = arith.constant 0 : i32
    return %c0_i32, %c0_i32_0 : i32, i32
  }
  func.func @transform_4(%arg0: i32) -> (i32, i32) {
    %c0_i32 = arith.constant 0 : i32
    %c0_i32_0 = arith.constant 0 : i32
    %c0_i32_1 = arith.constant 0 : i32
    return %c0_i32, %c0_i32_0 : i32, i32
  }
  func.func @transform_5(%arg0: i32) -> (i32, i32) {
    %c0_i32 = arith.constant 0 : i32
    %c0_i32_0 = arith.constant 0 : i32
    %c0_i32_1 = arith.constant 0 : i32
    return %c0_i32, %c0_i32_0 : i32, i32
  }
  func.func @transform_6(%arg0: i32) -> (i32, i32) {
    %c0_i32 = arith.constant 0 : i32
    %c0_i32_0 = arith.constant 0 : i32
    %c0_i32_1 = arith.constant 0 : i32
    return %c0_i32, %c0_i32_0 : i32, i32
  }
  func.func @transform_7(%arg0: i32) -> (i32, i32) {
    %c0_i32 = arith.constant 0 : i32
    %c0_i32_0 = arith.constant 0 : i32
    %c0_i32_1 = arith.constant 0 : i32
    return %c0_i32, %c0_i32_0 : i32, i32
  }
  func.func @transform_8(%arg0: i32) -> (i32, i32) {
    %c0_i32 = arith.constant 0 : i32
    %c0_i32_0 = arith.constant 0 : i32
    %c0_i32_1 = arith.constant 0 : i32
    return %c0_i32, %c0_i32_0 : i32, i32
  }
  func.func @transform_9(%arg0: i32) -> (i32, i32) {
    %c0_i32 = arith.constant 0 : i32
    %c0_i32_0 = arith.constant 0 : i32
    return %arg0, %c0_i32 : i32, i32
  }
  func.func @transform_10(%arg0: i32) -> (i32, i32) {
    %c0_i32 = arith.constant 0 : i32
    %c0_i32_0 = arith.constant 0 : i32
    return %arg0, %c0_i32 : i32, i32
  }
}

</mosaic_0001>

<bundles_post_ra>
// kernel: tpu_custom_call.1
= control target key start
LH: loop header
LB: loop body
LE: loop exit
PB: predicated region body
PF: predicated region fallthrough
CT: control target
= control target key end

     0   :  { %vm43_vm0 = vcmask 261120   ;;  %vm80_vm1 = vcmask 523264   ;;  %vm136_vm2 = vcmask 31744   ;;  %vm166_vm3 = vcmask 23552   ;;  %s323_s1 = inlined_call_operand.vmem [shape: f32[32,64], index: 1, kind: input, shape index: {}]   ;;  %s324_s3 = inlined_call_operand.vmem [shape: f32[64,32], index: 3, kind: input, shape index: {}]   ;;  %s325_s0 = inlined_call_operand.vmem [shape: f32[8,32], index: 0, kind: input, shape index: {}]   ;;  %s326_s2 = inlined_call_operand.vmem [shape: f32[1,64], index: 2, kind: input, shape index: {}]   ;;  %s327_s4 = inlined_call_operand.vmem [shape: f32[1,32], index: 4, kind: input, shape index: {}]   ;;  %s328_s5 = inlined_call_operand.vmem [shape: f32[32,4], index: 5, kind: input, shape index: {}]   ;;  %s329_s7 = inlined_call_operand.vmem [shape: f32[32,3], index: 7, kind: input, shape index: {}]   ;;  %s330_s6 = inlined_call_operand.vmem [shape: f32[1,4], index: 6, kind: input, shape index: {}]   ;;  %s331_s8 = inlined_call_operand.vmem [shape: f32[1,3], index: 8, kind: input, shape index: {}]   ;;  %s332_s9 = inlined_call_operand.vmem [shape: f32[8,4], index: 9, kind: output, shape index: {0}]   ;;  %s333_s10 = inlined_call_operand.vmem [shape: f32[8,3], index: 10, kind: output, shape index: {1}]  }
   0x1   :  { %v38_v0 = vld [vmem:[%s323_s1 + $0x18] sm:$0xff]  ;;  %v37_v1 = vld [vmem:[%s323_s1 + $0x10] sm:$0xff]  ;;  %v36_v3 = vld [vmem:[%s323_s1 + $0x8] sm:$0xff] }
   0x2   :  { %59 = vmatpush.msra.mxu0 %v38_v0  ;;  %v75_v2 = vld [vmem:[%s324_s3 + $0x38] sm:$0xff]  ;;  %v74_v4 = vld [vmem:[%s324_s3 + $0x30] sm:$0xff]  ;;  %v73_v5 = vld [vmem:[%s324_s3 + $0x28] sm:$0xff] }
   0x3   :  { %92 = vmatpush.msra.mxu1 %v75_v2  ;;  %v35_v6 = vld [vmem:[%s323_s1] sm:$0xff]  ;;  %v71_v9 = vld [vmem:[%s324_s3 + $0x18] sm:$0xff]  ;;  %v70_v10 = vld [vmem:[%s324_s3 + $0x10] sm:$0xff] }
   0x4   :  { %60 = vmatpush.msra.mxu0 %v37_v1  ;;  %v34_v7 = vld [vmem:[%s325_s0] sm:$0xff]  ;;  %v69_v11 = vld [vmem:[%s324_s3 + $0x8] sm:$0xff]  ;;  %v108_v13 = vld [vmem:[%s328_s5 + $0x18] sm:$0xff] }
   0x5   :  { %93 = vmatpush.msra.mxu1 %v74_v4  ;;  %v72_v8 = vld [vmem:[%s324_s3 + $0x20] sm:$0xff]  ;;  %v141_v14 = vld [vmem:[%s329_s7 + $0x18] sm:$0xff]  ;;  %128 = vmatpush.msra.mxu2 %v108_v13  ;;  %v107_v19 = vld [vmem:[%s328_s5 + $0x10] sm:$0xff] }
   0x6   :  { %61 = vmatpush.msra.mxu0 %v36_v3  ;;  %v68_v12 = vld [vmem:[%s324_s3] sm:$0xff]  ;;  %158 = vmatpush.msra.mxu3 %v141_v14  ;;  %v140_v20 = vld [vmem:[%s329_s7 + $0x10] sm:$0xff]  ;;  %v106_v21 = vld [vmem:[%s328_s5 + $0x8] sm:$0xff] }
   0x7   :  { %94 = vmatpush.msra.mxu1 %v73_v5  ;;  %v180_v15 = vld [vmem:[%s326_s2] ss:$0 sm:$0xff]  ;;  %129 = vmatpush.msra.mxu2 %v107_v19  ;;  %v139_v22 = vld [vmem:[%s329_s7 + $0x8] sm:$0xff] }
   0x8   :  { %62 = vmatpush.msra.mxu0 %v35_v6  ;;  %159 = vmatpush.msra.mxu3 %v140_v20  ;;  %v105_v23 = vld [vmem:[%s328_s5] sm:$0xff] }
   0x9   :  { %176 = vmatmul.msk.f32.vlgmr.msra.gmra.mxu0 %vm43_vm0, %v34_v7  ;;  %95 = vmatpush.msra.mxu1 %v72_v8  ;;  %v138_v24 = vld [vmem:[%s329_s7] sm:$0xff] }
   0xa   :  { %130 = vmatpush.msra.mxu2 %v106_v21  ;;  %160 = vmatpush.msra.mxu3 %v139_v22  ;;  %v181_v25 = vld [vmem:[%s327_s4] ss:$0 sm:$0xff] }
   0xb   :  { %96 = vmatpush.msra.mxu1 %v71_v9  ;;  %v182_v29 = vld [vmem:[%s330_s6] ss:$0 sm:$0xff] }
   0xc   :  { %131 = vmatpush.msra.mxu2 %v105_v23  ;;  %161 = vmatpush.msra.mxu3 %v138_v24  ;;  %v183_v30 = vld [vmem:[%s331_s8] ss:$0 sm:$0xff] }
   0xd   :  { %97 = vmatpush.msra.mxu1 %v70_v10 }
   0xf   :  { %98 = vmatpush.msra.mxu1 %v69_v11 }
  0x11   :  { %99 = vmatpush.msra.mxu1 %v68_v12 }
  0x86   :  { %v64_v16 = vpop.f32.mrf.mxu0 }
  0x87   :  { %v65_v17 = vadd.f32 %v180_v15, %v64_v16 }
  0x89   :  { %v67_v18 = vmax.f32 %v65_v17, 0.0 }
  0x8b   :  { %177 = vmatmul.msk.f32.vlgmr.msra.gmra.mxu1 %vm80_vm1, %v67_v18 }
 0x108   :  { %v101_v26 = vpop.f32.mrf.mxu1 }
 0x109   :  { %v102_v27 = vadd.f32 %v181_v25, %v101_v26 }
 0x10b   :  { %v104_v28 = vmax.f32 %v102_v27, 0.0 }
 0x10d   :  { %178 = vmatmul.msk.f32.vlgmr.msra.gmra.mxu2 %vm43_vm0, %v104_v28  ;;  %179 = vmatmul.msk.f32.vlgmr.msra.gmra.mxu3 %vm43_vm0, %v104_v28 }
 0x190   :  { %v133_v31 = vpop.f32.mrf.mxu2  ;;  %v163_v32 = vpop.f32.mrf.mxu3 }
 0x191   :  { %v134_v33 = vadd.f32 %v182_v29, %v133_v31  ;;  %v164_v34 = vadd.f32 %v183_v30, %v163_v32 }
 0x193   :  { %137 = vst.msk [vmem:[%s332_s9] sm:$0xff] %vm136_vm2, %v134_v33 }
 0x194   :  { %167 = vst.msk [vmem:[%s333_s10] sm:$0xff] %vm166_vm3, %v164_v34 }

</bundles_post_ra>
